<compile_context>
chip_gen: v7x
topology: tpu7x:2x2x1
jax: 0.10.0
libtpu: 0.0.40
codegen_flags: <defaults>
</compile_context>

<pallas_src>
import functools

import jax
import jax.numpy as jnp
from jax.experimental import pallas as pl
from jax.experimental.pallas import tpu as pltpu


# ----------------------------------------------------------------------------
# Single fused kernel: embedding lookup + init linear + bcast propagation +
# n_hops aggregation + gate + link gather/concat + decoder.
# ----------------------------------------------------------------------------
def _pagnn_fused_kernel(node_tab_ref, nodes_id_ref, w_init_ref, b_init_ref,
                        adj_ref, w_hops_ref, b_hops_ref,
                        src_row_ref, src_col_ref, dst_col_ref,
                        w_dec_ref, b_dec_ref, out_ref, *, n_hops, hidden):
    f32 = jnp.float32
    bf16 = jnp.bfloat16
    n_nodes = nodes_id_ref.shape[0]
    n_table = node_tab_ref.shape[0]
    n_links = src_col_ref.shape[0]

    # ---- 1. frozen embedding lookup: exact f32 one-hot selection matmul ----
    sel_tab = (jax.lax.broadcasted_iota(jnp.int32, (n_nodes, n_table), 1)
               == nodes_id_ref[...]).astype(f32)                         # [N,T]
    x = jnp.dot(sel_tab, node_tab_ref[...],
                preferred_element_type=f32)                              # [N,D]

    # ---- 2. node-init Linear: H0 = X @ W_init + b_init (bf16 MXU, f32 acc) --
    h = jnp.dot(x.astype(bf16), w_init_ref[...].astype(bf16),
                preferred_element_type=f32) + b_init_ref[...]            # [N,H]

    adj = adj_ref[...]                                                   # [N,N] f32

    # ---- 3. source-reachability indicator propagation (f32, in-kernel) -----
    src_ind = (jax.lax.broadcasted_iota(jnp.int32, (n_nodes, n_links), 0)
               == src_row_ref[...]).astype(f32)                          # [N,L]
    bcast = jnp.max(src_ind, axis=1, keepdims=True)                      # [N,1]
    for _ in range(n_hops):
        bcast = jnp.minimum(
            bcast + jnp.dot(adj, bcast, preferred_element_type=f32), 1.0)

    # ---- 4. n_hops aggregation: relu((A_hat @ H) @ W_k + b_k) --------------
    adj_b = adj.astype(bf16)
    for k in range(n_hops):
        m = jnp.dot(adj_b, h.astype(bf16), preferred_element_type=f32)   # [N,H]
        w_k = w_hops_ref[:, k * hidden:(k + 1) * hidden].astype(bf16)
        b_k = b_hops_ref[:, k * hidden:(k + 1) * hidden]
        h = jnp.maximum(
            jnp.dot(m.astype(bf16), w_k, preferred_element_type=f32) + b_k,
            0.0)                                                         # [N,H]

    # ---- 5. gate by reachability -------------------------------------------
    h = h * bcast                                                        # [N,H]

    # ---- 6. link gather + concat + decoder via exact f32 one-hot selects ---
    sel_src = (jax.lax.broadcasted_iota(jnp.int32, (n_links, n_nodes), 1)
               == src_col_ref[...]).astype(f32)                          # [L,N]
    sel_dst = (jax.lax.broadcasted_iota(jnp.int32, (n_links, n_nodes), 1)
               == dst_col_ref[...]).astype(f32)
    h_src = jnp.dot(sel_src, h, preferred_element_type=f32)              # [L,H]
    h_dst = jnp.dot(sel_dst, h, preferred_element_type=f32)              # [L,H]
    # concat(h_src, h_dst) @ W_dec == h_src @ W_dec[:H] + h_dst @ W_dec[H:]
    out = (jnp.dot(h_src, w_dec_ref[:hidden, :], preferred_element_type=f32)
           + jnp.dot(h_dst, w_dec_ref[hidden:, :], preferred_element_type=f32)
           + b_dec_ref[...])                                             # [L,O]
    out_ref[...] = out.astype(out_ref.dtype)


def pagnn_fused(node_table, nodes_id, w_init, b_init2, adj_hat,
                w_hops_packed, b_hops_packed, src_idx, dst_idx,
                w_dec, b_dec2, *, n_hops):
    """Whole PaGNN forward as one grid-less VMEM-resident pallas_call."""
    n_nodes = adj_hat.shape[0]
    n_links = src_idx.shape[0]
    hidden = w_init.shape[1]
    out_dim = w_dec.shape[1]

    kernel = functools.partial(_pagnn_fused_kernel,
                               n_hops=n_hops, hidden=hidden)
    vmem = pl.BlockSpec(memory_space=pltpu.MemorySpace.VMEM)

    return pl.pallas_call(
        kernel,
        out_shape=jax.ShapeDtypeStruct((n_links, out_dim), jnp.float32),
        in_specs=[vmem] * 12,   # grid=(): full arrays, no pipeline buffers
        out_specs=vmem,
    )(node_table.astype(jnp.float32),
      nodes_id.reshape(n_nodes, 1).astype(jnp.int32),
      w_init.astype(jnp.float32),
      b_init2.astype(jnp.float32),
      adj_hat.astype(jnp.float32),
      w_hops_packed.astype(jnp.float32),
      b_hops_packed.astype(jnp.float32),
      src_idx.reshape(1, n_links).astype(jnp.int32),
      src_idx.reshape(n_links, 1).astype(jnp.int32),
      dst_idx.reshape(n_links, 1).astype(jnp.int32),
      w_dec.astype(jnp.float32),
      b_dec2.astype(jnp.float32))


# ----------------------------------------------------------------------------
# PaGNNModel forward (jitted end-to-end; single Pallas launch inside)
# ----------------------------------------------------------------------------
@functools.partial(jax.jit, static_argnames=("n_hops",))
def pagnn_forward(params, nodes_id, adj_hat, src_idx, dst_idx, n_hops):
    return pagnn_fused(params["node_table"], nodes_id,
                       params["w_init"], params["b_init"], adj_hat,
                       params["w_hops"], params["b_hops"],
                       src_idx, dst_idx,
                       params["w_dec"], params["b_dec"], n_hops=n_hops)


# ----------------------------------------------------------------------------
# deterministic parameter / input construction
# ----------------------------------------------------------------------------
def make_params(key, num_total_nodes, node_dim, hidden_dim, out_dim, n_hops):
    ks = jax.random.split(key, 4 + n_hops)
    w_hops = [jax.random.normal(ks[3 + k], (hidden_dim, hidden_dim),
                                jnp.float32) * 0.1 for k in range(n_hops)]
    params = {
        "node_table": jax.random.normal(ks[0], (num_total_nodes, node_dim),
                                        jnp.float32) * 0.1,
        "w_init": jax.random.normal(ks[1], (node_dim, hidden_dim),
                                    jnp.float32) * 0.1,
        "b_init": jnp.zeros((1, hidden_dim), jnp.float32),
        # hop weights/biases packed lane-dense: static lane slice per hop
        "w_hops": jnp.concatenate(w_hops, axis=1),            # [H, n_hops*H]
        "b_hops": jnp.zeros((1, n_hops * hidden_dim), jnp.float32),
        "w_dec": jax.random.normal(ks[2], (2 * hidden_dim, out_dim),
                                   jnp.float32) * 0.1,
        "b_dec": jnp.zeros((1, out_dim), jnp.float32),
    }
    return params


if __name__ == "__main__":
    key = jax.random.PRNGKey(0)
    k_param, k_ids, k_adj, k_links = jax.random.split(key, 4)

    # small, deterministic shapes
    num_total_nodes = 100   # rows of the frozen node-feature table
    node_dim = 32           # node feature dim
    edge_dim = 8            # TODO(synk): edge features unused by this encoder approximation
    hidden_dim = 32
    out_dim = 2
    n_hops = 2
    n_sub_nodes = 64        # nodes in the batched subgraph
    n_links = 8             # link-prediction pairs

    params = make_params(k_param, num_total_nodes, node_dim, hidden_dim,
                         out_dim, n_hops)

    # subgraph node ids (indices into the frozen node table)
    nodes_id = jax.random.randint(k_ids, (n_sub_nodes,), 0, num_total_nodes)

    # dense row-normalized adjacency with self loops: A_hat = D^-1 (A + I)
    a = (jax.random.uniform(k_adj, (n_sub_nodes, n_sub_nodes)) < 0.1
         ).astype(jnp.float32)
    a = jnp.maximum(a, a.T) + jnp.eye(n_sub_nodes, dtype=jnp.float32)
    adj_hat = a / jnp.sum(a, axis=1, keepdims=True)

    # link endpoints (local node indices inside the subgraph)
    link_idx = jax.random.randint(k_links, (2, n_links), 0, n_sub_nodes)
    src_idx, dst_idx = link_idx[0], link_idx[1]

    out = pagnn_forward(params, nodes_id, adj_hat, src_idx, dst_idx,
                        n_hops=n_hops)
    out = jax.block_until_ready(out)
    assert out.shape == (n_links, out_dim), out.shape
    assert out.dtype == jnp.float32
    assert bool(jnp.all(jnp.isfinite(out)))
    print("KERNEL_OK")
</pallas_src>

<mosaic_0001>
module attributes {stable_mosaic.version = 11 : i64} {
  func.func @_pagnn_fused_kernel(%arg0: memref<100x32xf32, #tpu.memory_space<vmem>>, %arg1: memref<64x1xi32, #tpu.memory_space<vmem>>, %arg2: memref<32x32xf32, #tpu.memory_space<vmem>>, %arg3: memref<1x32xf32, #tpu.memory_space<vmem>>, %arg4: memref<64x64xf32, #tpu.memory_space<vmem>>, %arg5: memref<32x64xf32, #tpu.memory_space<vmem>>, %arg6: memref<1x64xf32, #tpu.memory_space<vmem>>, %arg7: memref<1x8xi32, #tpu.memory_space<vmem>>, %arg8: memref<8x1xi32, #tpu.memory_space<vmem>>, %arg9: memref<8x1xi32, #tpu.memory_space<vmem>>, %arg10: memref<64x2xf32, #tpu.memory_space<vmem>>, %arg11: memref<1x2xf32, #tpu.memory_space<vmem>>, %arg12: memref<8x2xf32, #tpu.memory_space<vmem>>) attributes {dimension_semantics = [], scalar_prefetch = 0 : i64, scratch_operands = 0 : i64, tpu.core_type = #tpu.core_type<tc>} {
    %0 = tpu.iota {dimensions = array<i32: 1>} : vector<64x100xi32>
    %c0 = arith.constant 0 : index
    %c0_0 = arith.constant 0 : index
    %1 = vector.load %arg1[%c0, %c0_0] : memref<64x1xi32, #tpu.memory_space<vmem>>, vector<64x1xi32>
    %2 = vector.broadcast %1 : vector<64x1xi32> to vector<64x100xi32>
    %3 = arith.cmpi eq, %0, %2 : vector<64x100xi32>
    %4 = arith.extui %3 : vector<64x100xi1> to vector<64x100xi32>
    %5 = arith.sitofp %4 : vector<64x100xi32> to vector<64x100xf32>
    %c0_1 = arith.constant 0 : index
    %c0_2 = arith.constant 0 : index
    %6 = vector.load %arg0[%c0_1, %c0_2] : memref<100x32xf32, #tpu.memory_space<vmem>>, vector<100x32xf32>
    %cst = arith.constant dense<0.000000e+00> : vector<64x32xf32>
    %7 = tpu.matmul %5, %6, %cst {dimension_numbers = #tpu.dot_dimension_numbers<[1], [0], [0], [1], [0, 0, 1, 1], [], []>} : vector<64x100xf32>, vector<100x32xf32>, vector<64x32xf32> -> vector<64x32xf32>
    %8 = arith.truncf %7 : vector<64x32xf32> to vector<64x32xbf16>
    %c0_3 = arith.constant 0 : index
    %c0_4 = arith.constant 0 : index
    %9 = vector.load %arg2[%c0_3, %c0_4] : memref<32x32xf32, #tpu.memory_space<vmem>>, vector<32x32xf32>
    %10 = arith.truncf %9 : vector<32x32xf32> to vector<32x32xbf16>
    %cst_5 = arith.constant dense<0.000000e+00> : vector<64x32xf32>
    %11 = tpu.matmul %8, %10, %cst_5 {dimension_numbers = #tpu.dot_dimension_numbers<[1], [0], [0], [1], [0, 0, 1, 1], [], []>} : vector<64x32xbf16>, vector<32x32xbf16>, vector<64x32xf32> -> vector<64x32xf32>
    %c0_6 = arith.constant 0 : index
    %c0_7 = arith.constant 0 : index
    %12 = vector.load %arg3[%c0_6, %c0_7] : memref<1x32xf32, #tpu.memory_space<vmem>>, vector<1x32xf32>
    %13 = vector.broadcast %12 : vector<1x32xf32> to vector<64x32xf32>
    %14 = arith.addf %11, %13 : vector<64x32xf32>
    %c0_8 = arith.constant 0 : index
    %c0_9 = arith.constant 0 : index
    %15 = vector.load %arg4[%c0_8, %c0_9] : memref<64x64xf32, #tpu.memory_space<vmem>>, vector<64x64xf32>
    %16 = tpu.iota {dimensions = array<i32: 0>} : vector<64x8xi32>
    %c0_10 = arith.constant 0 : index
    %c0_11 = arith.constant 0 : index
    %17 = vector.load %arg7[%c0_10, %c0_11] : memref<1x8xi32, #tpu.memory_space<vmem>>, vector<1x8xi32>
    %18 = vector.broadcast %17 : vector<1x8xi32> to vector<64x8xi32>
    %19 = arith.cmpi eq, %16, %18 : vector<64x8xi32>
    %20 = arith.extui %19 : vector<64x8xi1> to vector<64x8xi32>
    %21 = arith.sitofp %20 : vector<64x8xi32> to vector<64x8xf32>
    %cst_12 = arith.constant dense<0xFF800000> : vector<64xf32>
    %22 = vector.multi_reduction <maximumf>, %21, %cst_12 [1] : vector<64x8xf32> to vector<64xf32>
    %23 = vector.shape_cast %22 : vector<64xf32> to vector<64x1xf32>
    %cst_13 = arith.constant dense<0.000000e+00> : vector<64x1xf32>
    %24 = tpu.matmul %15, %23, %cst_13 {dimension_numbers = #tpu.dot_dimension_numbers<[1], [0], [0], [1], [0, 0, 1, 1], [], []>} : vector<64x64xf32>, vector<64x1xf32>, vector<64x1xf32> -> vector<64x1xf32>
    %25 = arith.addf %23, %24 : vector<64x1xf32>
    %cst_14 = arith.constant 1.000000e+00 : f32
    %26 = vector.broadcast %cst_14 : f32 to vector<64x1xf32>
    %27 = arith.minimumf %25, %26 : vector<64x1xf32>
    %cst_15 = arith.constant dense<0.000000e+00> : vector<64x1xf32>
    %28 = tpu.matmul %15, %27, %cst_15 {dimension_numbers = #tpu.dot_dimension_numbers<[1], [0], [0], [1], [0, 0, 1, 1], [], []>} : vector<64x64xf32>, vector<64x1xf32>, vector<64x1xf32> -> vector<64x1xf32>
    %29 = arith.addf %27, %28 : vector<64x1xf32>
    %cst_16 = arith.constant 1.000000e+00 : f32
    %30 = vector.broadcast %cst_16 : f32 to vector<64x1xf32>
    %31 = arith.minimumf %29, %30 : vector<64x1xf32>
    %32 = arith.truncf %15 : vector<64x64xf32> to vector<64x64xbf16>
    %33 = arith.truncf %14 : vector<64x32xf32> to vector<64x32xbf16>
    %cst_17 = arith.constant dense<0.000000e+00> : vector<64x32xf32>
    %34 = tpu.matmul %32, %33, %cst_17 {dimension_numbers = #tpu.dot_dimension_numbers<[1], [0], [0], [1], [0, 0, 1, 1], [], []>} : vector<64x64xbf16>, vector<64x32xbf16>, vector<64x32xf32> -> vector<64x32xf32>
    %c0_18 = arith.constant 0 : index
    %c0_19 = arith.constant 0 : index
    %35 = vector.load %arg5[%c0_18, %c0_19] : memref<32x64xf32, #tpu.memory_space<vmem>>, vector<32x32xf32>
    %36 = arith.truncf %35 : vector<32x32xf32> to vector<32x32xbf16>
    %c0_20 = arith.constant 0 : index
    %c0_21 = arith.constant 0 : index
    %37 = vector.load %arg6[%c0_20, %c0_21] : memref<1x64xf32, #tpu.memory_space<vmem>>, vector<1x32xf32>
    %38 = arith.truncf %34 : vector<64x32xf32> to vector<64x32xbf16>
    %cst_22 = arith.constant dense<0.000000e+00> : vector<64x32xf32>
    %39 = tpu.matmul %38, %36, %cst_22 {dimension_numbers = #tpu.dot_dimension_numbers<[1], [0], [0], [1], [0, 0, 1, 1], [], []>} : vector<64x32xbf16>, vector<32x32xbf16>, vector<64x32xf32> -> vector<64x32xf32>
    %40 = vector.broadcast %37 : vector<1x32xf32> to vector<64x32xf32>
    %41 = arith.addf %39, %40 : vector<64x32xf32>
    %cst_23 = arith.constant 0.000000e+00 : f32
    %42 = vector.broadcast %cst_23 : f32 to vector<64x32xf32>
    %43 = arith.maximumf %41, %42 : vector<64x32xf32>
    %44 = arith.truncf %43 : vector<64x32xf32> to vector<64x32xbf16>
    %cst_24 = arith.constant dense<0.000000e+00> : vector<64x32xf32>
    %45 = tpu.matmul %32, %44, %cst_24 {dimension_numbers = #tpu.dot_dimension_numbers<[1], [0], [0], [1], [0, 0, 1, 1], [], []>} : vector<64x64xbf16>, vector<64x32xbf16>, vector<64x32xf32> -> vector<64x32xf32>
    %c0_25 = arith.constant 0 : index
    %c32 = arith.constant 32 : index
    %46 = vector.load %arg5[%c0_25, %c32] : memref<32x64xf32, #tpu.memory_space<vmem>>, vector<32x32xf32>
    %47 = arith.truncf %46 : vector<32x32xf32> to vector<32x32xbf16>
    %c0_26 = arith.constant 0 : index
    %c32_27 = arith.constant 32 : index
    %48 = vector.load %arg6[%c0_26, %c32_27] : memref<1x64xf32, #tpu.memory_space<vmem>>, vector<1x32xf32>
    %49 = arith.truncf %45 : vector<64x32xf32> to vector<64x32xbf16>
    %cst_28 = arith.constant dense<0.000000e+00> : vector<64x32xf32>
    %50 = tpu.matmul %49, %47, %cst_28 {dimension_numbers = #tpu.dot_dimension_numbers<[1], [0], [0], [1], [0, 0, 1, 1], [], []>} : vector<64x32xbf16>, vector<32x32xbf16>, vector<64x32xf32> -> vector<64x32xf32>
    %51 = vector.broadcast %48 : vector<1x32xf32> to vector<64x32xf32>
    %52 = arith.addf %50, %51 : vector<64x32xf32>
    %cst_29 = arith.constant 0.000000e+00 : f32
    %53 = vector.broadcast %cst_29 : f32 to vector<64x32xf32>
    %54 = arith.maximumf %52, %53 : vector<64x32xf32>
    %55 = vector.broadcast %31 : vector<64x1xf32> to vector<64x32xf32>
    %56 = arith.mulf %54, %55 : vector<64x32xf32>
    %57 = tpu.iota {dimensions = array<i32: 1>} : vector<8x64xi32>
    %c0_30 = arith.constant 0 : index
    %c0_31 = arith.constant 0 : index
    %58 = vector.load %arg8[%c0_30, %c0_31] : memref<8x1xi32, #tpu.memory_space<vmem>>, vector<8x1xi32>
    %59 = vector.broadcast %58 : vector<8x1xi32> to vector<8x64xi32>
    %60 = arith.cmpi eq, %57, %59 : vector<8x64xi32>
    %61 = arith.extui %60 : vector<8x64xi1> to vector<8x64xi32>
    %62 = arith.sitofp %61 : vector<8x64xi32> to vector<8x64xf32>
    %63 = tpu.iota {dimensions = array<i32: 1>} : vector<8x64xi32>
    %c0_32 = arith.constant 0 : index
    %c0_33 = arith.constant 0 : index
    %64 = vector.load %arg9[%c0_32, %c0_33] : memref<8x1xi32, #tpu.memory_space<vmem>>, vector<8x1xi32>
    %65 = vector.broadcast %64 : vector<8x1xi32> to vector<8x64xi32>
    %66 = arith.cmpi eq, %63, %65 : vector<8x64xi32>
    %67 = arith.extui %66 : vector<8x64xi1> to vector<8x64xi32>
    %68 = arith.sitofp %67 : vector<8x64xi32> to vector<8x64xf32>
    %cst_34 = arith.constant dense<0.000000e+00> : vector<8x32xf32>
    %69 = tpu.matmul %62, %56, %cst_34 {dimension_numbers = #tpu.dot_dimension_numbers<[1], [0], [0], [1], [0, 0, 1, 1], [], []>} : vector<8x64xf32>, vector<64x32xf32>, vector<8x32xf32> -> vector<8x32xf32>
    %cst_35 = arith.constant dense<0.000000e+00> : vector<8x32xf32>
    %70 = tpu.matmul %68, %56, %cst_35 {dimension_numbers = #tpu.dot_dimension_numbers<[1], [0], [0], [1], [0, 0, 1, 1], [], []>} : vector<8x64xf32>, vector<64x32xf32>, vector<8x32xf32> -> vector<8x32xf32>
    %c0_36 = arith.constant 0 : index
    %c0_37 = arith.constant 0 : index
    %71 = vector.load %arg10[%c0_36, %c0_37] : memref<64x2xf32, #tpu.memory_space<vmem>>, vector<32x2xf32>
    %cst_38 = arith.constant dense<0.000000e+00> : vector<8x2xf32>
    %72 = tpu.matmul %69, %71, %cst_38 {dimension_numbers = #tpu.dot_dimension_numbers<[1], [0], [0], [1], [0, 0, 1, 1], [], []>} : vector<8x32xf32>, vector<32x2xf32>, vector<8x2xf32> -> vector<8x2xf32>
    %c32_39 = arith.constant 32 : index
    %c0_40 = arith.constant 0 : index
    %73 = vector.load %arg10[%c32_39, %c0_40] : memref<64x2xf32, #tpu.memory_space<vmem>>, vector<32x2xf32>
    %cst_41 = arith.constant dense<0.000000e+00> : vector<8x2xf32>
    %74 = tpu.matmul %70, %73, %cst_41 {dimension_numbers = #tpu.dot_dimension_numbers<[1], [0], [0], [1], [0, 0, 1, 1], [], []>} : vector<8x32xf32>, vector<32x2xf32>, vector<8x2xf32> -> vector<8x2xf32>
    %75 = arith.addf %72, %74 : vector<8x2xf32>
    %c0_42 = arith.constant 0 : index
    %c0_43 = arith.constant 0 : index
    %76 = vector.load %arg11[%c0_42, %c0_43] : memref<1x2xf32, #tpu.memory_space<vmem>>, vector<1x2xf32>
    %77 = vector.broadcast %76 : vector<1x2xf32> to vector<8x2xf32>
    %78 = arith.addf %75, %77 : vector<8x2xf32>
    %c0_44 = arith.constant 0 : index
    %c0_45 = arith.constant 0 : index
    %79 = vector.load %arg12[%c0_44, %c0_45] : memref<8x2xf32, #tpu.memory_space<vmem>>, vector<8x2xf32>
    tpu.vector_store %arg12[%c0_44, %c0_45], %78 {strides = array<i32>} : memref<8x2xf32, #tpu.memory_space<vmem>>, vector<8x2xf32>,
    return
  }
}

</mosaic_0001>

<bundles_post_ra>
// kernel: pagnn_forward.1
= control target key start
LH: loop header
LB: loop body
LE: loop exit
PB: predicated region body
PF: predicated region fallthrough
CT: control target
= control target key end

     0   :  { %v1919_v0 = vmov 0   ;;  %vm138_vm0 = vcmask 1043456   ;;  %v42_v28 = vlaneseq  ;;  %v1920_v33 = vmov 0.0   ;;  %s2401_s1 = inlined_call_operand.vmem [shape: s32[64,1], index: 1, kind: input, shape index: {}]   ;;  %s2402_s0 = inlined_call_operand.vmem [shape: f32[100,32], index: 0, kind: input, shape index: {}]   ;;  %s2403_s7 = inlined_call_operand.vmem [shape: s32[1,8], index: 7, kind: input, shape index: {}]   ;;  %s2404_s2 = inlined_call_operand.vmem [shape: f32[32,32], index: 2, kind: input, shape index: {}]   ;;  %s2405_s4 = inlined_call_operand.vmem [shape: f32[64,64], index: 4, kind: input, shape index: {}]   ;;  %s2406_s3 = inlined_call_operand.vmem [shape: f32[1,32], index: 3, kind: input, shape index: {}]   ;;  %s2407_s5 = inlined_call_operand.vmem [shape: f32[32,64], index: 5, kind: input, shape index: {}]   ;;  %s2408_s6 = inlined_call_operand.vmem [shape: f32[1,64], index: 6, kind: input, shape index: {}]   ;;  %s2409_s8 = inlined_call_operand.vmem [shape: s32[8,1], index: 8, kind: input, shape index: {}]   ;;  %s2410_s9 = inlined_call_operand.vmem [shape: s32[8,1], index: 9, kind: input, shape index: {}]   ;;  %s2411_s10 = inlined_call_operand.vmem [shape: f32[64,2], index: 10, kind: input, shape index: {}]   ;;  %s2412_s11 = inlined_call_operand.vmem [shape: f32[1,2], index: 11, kind: input, shape index: {}]   ;;  %s2413_s12 = inlined_call_operand.vmem [shape: f32[8,2], index: 12, kind: output, shape index: {}]  }
   0x1   :  { %1918 = vset.pattern.permute.xlu1 %v1919_v0  ;;  %1917 = vset.pattern.permute.xlu0 %v1919_v0  ;;  %v46_v1 = vld [vmem:[%s2401_s1 + $0x10] sm:$0xff]  ;;  %v44_v2 = vld [vmem:[%s2401_s1] sm:$0xff]  ;;  %v47_v3 = vld [vmem:[%s2401_s1 + $0x18] sm:$0xff]  ;;  %vm388_vm2 = vcmask 64512   ;;  %vm113_vm10 = vcmask 818176  }
   0x2   :  { %59 = vperm.xlu1 %1918, %v46_v1   ;;  %53 = vperm.xlu0 %1917, %v44_v2   ;;  %v45_v4 = vld [vmem:[%s2401_s1 + $0x8] sm:$0xff]  ;;  %v100_v5 = vld [vmem:[%s2402_s0] sm:$0xff]  ;;  %v102_v7 = vld [vmem:[%s2402_s0 + $0x10] sm:$0xff]  ;;  %v351_v29 = vshrl.u32 %v42_v28, 7  ;;  %v2071_v55 = vand.u32 127, %v42_v28 }
   0x3   :  { %v101_v6 = vld [vmem:[%s2402_s0 + $0x8] sm:$0xff]  ;;  %v103_v8 = vld [vmem:[%s2402_s0 + $0x18] sm:$0xff]  ;;  %v104_v11 = vld [vmem:[%s2402_s0 + $0x20] sm:$0xff] }
   0x4   :  { %v1820_v9 = vpack.c.bf16 %v101_v6, %v100_v5  ;;  %v1824_v10 = vpack.c.bf16 %v103_v8, %v102_v7  ;;  %v105_v12 = vld [vmem:[%s2402_s0 + $0x28] sm:$0xff]  ;;  %v48_v14 = vld [vmem:[%s2401_s1 + $0x20] sm:$0xff]  ;;  %v106_v16 = vld [vmem:[%s2402_s0 + $0x30] sm:$0xff]  ;;  %v353_v31 = vadd.s32 16, %v351_v29  ;;  %v352_v32 = vadd.s32 8, %v351_v29 }
   0x5   :  { %v49_v13 = vld [vmem:[%s2401_s1 + $0x28] sm:$0xff]  ;;  %v1828_v15 = vpack.c.bf16 %v105_v12, %v104_v11  ;;  %v107_v17 = vld [vmem:[%s2402_s0 + $0x38] sm:$0xff]  ;;  %v50_v19 = vld [vmem:[%s2401_s1 + $0x30] sm:$0xff]  ;;  %v354_v35 = vadd.s32 24, %v351_v29  ;;  %v355_v36 = vadd.s32 32, %v351_v29  ;;  %v356_v40 = vadd.s32 40, %v351_v29 }
   0x6   :  { %62 = vperm.xlu1 %1918, %v47_v3   ;;  %56 = vperm.xlu0 %1917, %v45_v4   ;;  %v51_v18 = vld [vmem:[%s2401_s1 + $0x38] sm:$0xff]  ;;  %v1832_v20 = vpack.c.bf16 %v107_v17, %v106_v16  ;;  %v108_v21 = vld [vmem:[%s2402_s0 + $0x40] sm:$0xff]  ;;  %v109_v22 = vld [vmem:[%s2402_s0 + $0x48] sm:$0xff]  ;;  %v357_v41 = vadd.s32 48, %v351_v29  ;;  %v358_v46 = vadd.s32 56, %v351_v29 }
   0x7   :  { %1821 = vmatprep.subr.bf16.mxu0 %v1820_v9  ;;  %v1836_v23 = vpack.c.bf16 %v109_v22, %v108_v21  ;;  %v110_v24 = vld [vmem:[%s2402_s0 + $0x50] sm:$0xff]  ;;  %v111_v25 = vld [vmem:[%s2402_s0 + $0x58] sm:$0xff]  ;;  %v112_v27 = vld [vmem:[%s2402_s0 + $0x60] sm:$0xf] }
   0x8   :  { %1823 = vmatpush3.bf16.msra.mxu0 %v1820_v9  ;;  %v1840_v26 = vpack.c.bf16 %v111_v25, %v110_v24  ;;  %v1434_v30 = vld [vmem:[%s2403_s7] ss:$0 sm:$0xff]  ;;  %v252_v9 = vld [vmem:[%s2404_s2 + $0x8] sm:$0xff]  ;;  %v253_v11 = vld [vmem:[%s2404_s2 + $0x10] sm:$0xff] }
   0x9   :  { %1825 = vmatprep.subr.bf16.mxu0 %v1824_v10  ;;  %vm364_vm1 = vcmp.eq.s32.totalorder %v351_v29, %v1434_v30  ;;  %vm366_vm3 = vcmp.eq.s32.totalorder %v353_v31, %v1434_v30  ;;  %vm365_vm4 = vcmp.eq.s32.totalorder %v352_v32, %v1434_v30  ;;  %vm367_vm5 = vcmp.eq.s32.totalorder %v354_v35, %v1434_v30  ;;  %v251_v8 = vld [vmem:[%s2404_s2] sm:$0xff]  ;;  %v254_v12 = vld [vmem:[%s2404_s2 + $0x18] sm:$0xff] }
   0xa   :  { %68 = vperm.xlu1 %1918, %v49_v13   ;;  %65 = vperm.xlu0 %1917, %v48_v14   ;;  %v1435_v34 = vsel %vm364_vm1, 1.0, %v1920_v33  ;;  %v1437_v38 = vsel %vm366_vm3, 1.0, %v1920_v33  ;;  %v1436_v39 = vsel %vm365_vm4, 1.0, %v1920_v33  ;;  %vm368_vm6 = vcmp.eq.s32.totalorder %v355_v36, %v1434_v30  ;;  %v342_v17 = vld [vmem:[%s2405_s4] sm:$0xff] }
   0xb   :  { %v389_v37 = vsel %vm388_vm2, %v1435_v34, -inf  ;;  %v395_v42 = vsel %vm388_vm2, %v1437_v38, -inf  ;;  %v392_v43 = vsel %vm388_vm2, %v1436_v39, -inf  ;;  %v1438_v44 = vsel %vm367_vm5, 1.0, %v1920_v33 }
   0xc   :  { %1827 = vmatpush3.bf16.msra.mxu0 %v1824_v10  ;;  %v1439_v45 = vsel %vm368_vm6, 1.0, %v1920_v33  ;;  %vm369_vm7 = vcmp.eq.s32.totalorder %v356_v40, %v1434_v30  ;;  %vm370_vm8 = vcmp.eq.s32.totalorder %v357_v41, %v1434_v30  ;;  %v398_v47 = vsel %vm388_vm2, %v1438_v44, -inf  ;;  %v2168_v44 = vld [vmem:[%s2405_s4 + $0x20] sm:$0xff] }
   0xd   :  { %1829 = vmatprep.subr.bf16.mxu0 %v1828_v15  ;;  %v401_v48 = vsel %vm388_vm2, %v1439_v45, -inf  ;;  %v1440_v49 = vsel %vm369_vm7, 1.0, %v1920_v33  ;;  %v1441_v50 = vsel %vm370_vm8, 1.0, %v1920_v33  ;;  %vm371_vm9 = vcmp.eq.s32.totalorder %v358_v46, %v1434_v30  ;;  %v2177_v45 = vld [vmem:[%s2405_s4 + $0x28] sm:$0xff]  ;;  %v2182_v46 = vld [vmem:[%s2405_s4 + $0x30] sm:$0xff] }
   0xe   :  { %74 = vperm.xlu1 %1918, %v51_v18   ;;  %71 = vperm.xlu0 %1917, %v50_v19   ;;  %v404_v51 = vsel %vm388_vm2, %v1440_v49, -inf  ;;  %v407_v52 = vsel %vm388_vm2, %v1441_v50, -inf  ;;  %v1442_v53 = vsel %vm371_vm9, 1.0, %v1920_v33  ;;  %v255_v10 = vpack.c.bf16 %v252_v9, %v251_v8  ;;  %v2121_v18 = vld [vmem:[%s2405_s4 + $0x8] sm:$0xff]  ;;  %v1429_v49 = vld [vmem:[%s2406_s3] ss:$0 sm:$0xff] }
   0xf   :  { %v410_v54 = vsel %vm388_vm2, %v1442_v53, -inf  ;;  %v256_v13 = vpack.c.bf16 %v254_v12, %v253_v11  ;;  %v2124_v19 = vpack.c.bf16 %v2121_v18, %v342_v17  ;;  %vm413_vm3 = vcmask 523264  }
  0x10   :  { %1831 = vmatpush3.bf16.msra.mxu0 %v1828_v15  ;;  %1636 = vmatprep.subr.bf16.mxu1 %v255_v10  ;;  %vm264_vm4 = vcmask 261120   ;;  %vm1923_vm5 = vmmov 0   ;;  %vm1406_vm8 = vcmask 15360  }
  0x11   :  { %1833 = vmatprep.subr.bf16.mxu0 %v1832_v20  ;;  %1637 = vmatpush3.bf16.msra.mxu1 %v255_v10 }
  0x12   :  { %1638 = vmatprep.subr.bf16.mxu1 %v256_v13 }
  0x14   :  { %1835 = vmatpush3.bf16.msra.mxu0 %v1832_v20 }
  0x15   :  { %1837 = vmatprep.subr.bf16.mxu0 %v1836_v23  ;;  %1639 = vmatpush3.bf16.msra.mxu1 %v256_v13 }
  0x18   :  { %1839 = vmatpush3.bf16.msra.mxu0 %v1836_v23 }
  0x19   :  { %1841 = vmatprep.subr.bf16.mxu0 %v1840_v26 }
  0x1c   :  { %1843 = vmatpush3.bf16.msra.mxu0 %v1840_v26 }
  0x1d   :  { %1622 = vmatprep.subr.msk.mxu0 %vm138_vm0, %v112_v27 }
  0x20   :  { %1623 = vmatpush3.msk.msra.mxu0 %vm138_vm0, %v112_v27 }
  0x2d   :  { %390 = vmax.xlane.f32.xlu0 %v389_v37 }
  0x31   :  { %396 = vmax.xlane.f32.xlu0 %v395_v42  ;;  %v2154_v42 = vld [vmem:[%s2405_s4 + $0x10] sm:$0xff] }
  0x32   :  { %393 = vmax.xlane.f32.xlu1 %v392_v43  ;;  %v2163_v43 = vld [vmem:[%s2405_s4 + $0x18] sm:$0xff] }
  0x33   :  { %v2208_v11 = vpack.c.bf16 %v2163_v43, %v2154_v42 }
  0x35   :  { %399 = vmax.xlane.f32.xlu0 %v398_v47  ;;  %v2191_v47 = vld [vmem:[%s2405_s4 + $0x38] sm:$0xff] }
  0x36   :  { %402 = vmax.xlane.f32.xlu1 %v401_v48 }
  0x39   :  { %405 = vmax.xlane.f32.xlu0 %v404_v51 }
  0x3a   :  { %408 = vmax.xlane.f32.xlu1 %v407_v52 }
  0x3d   :  { %411 = vmax.xlane.f32.xlu0 %v410_v54 }
  0x81   :  { %v60_v56 = vpop.permute.xlu1 %59  ;;  %v54_v57 = vpop.permute.xlu0 %53 }
  0x82   :  { %vm76_vm11 = vcmp.eq.s32.totalorder %v2071_v55, %v54_v57  ;;  %vm78_vm12 = vcmp.eq.s32.totalorder %v2071_v55, %v60_v56 }
  0x83   :  { %v1412_v58 = vsel %vm76_vm11, 1.0, %v1920_v33  ;;  %v1414_v61 = vsel %vm78_vm12, 1.0, %v1920_v33 }
  0x84   :  { %1624 = vmatprep.mubr.msk.f32.mxu0 %vm113_vm10, %v1412_v58 }
  0x85   :  { %v63_v59 = vpop.permute.xlu1 %62  ;;  %v57_v60 = vpop.permute.xlu0 %56 }
  0x86   :  { %vm77_vm13 = vcmp.eq.s32.totalorder %v2071_v55, %v57_v60  ;;  %vm79_vm14 = vcmp.eq.s32.totalorder %v2071_v55, %v63_v59 }
  0x87   :  { %v1413_v62 = vsel %vm77_vm13, 1.0, %v1920_v33  ;;  %v1415_v1 = vsel %vm79_vm14, 1.0, %v1920_v33 }
  0x88   :  { %1625 = vmatmul.mubr.msk.f32.vlgmr.msra.gmra.mrb[0].mxu0 %vm113_vm10, %v1413_v62 }
  0x89   :  { %v69_v63 = vpop.permute.xlu1 %68  ;;  %v66_v0 = vpop.permute.xlu0 %65  ;;  %1627 = vmatprep.mubr.msk.f32.mxu0 %vm113_vm10, %v1414_v61 }
  0x8a   :  { %vm80_vm15 = vcmp.eq.s32.totalorder %v2071_v55, %v66_v0  ;;  %vm81_vm0 = vcmp.eq.s32.totalorder %v2071_v55, %v69_v63 }
  0x8b   :  { %v1416_v2 = vsel %vm80_vm15, 1.0, %v1920_v33  ;;  %v1417_v5 = vsel %vm81_vm0, 1.0, %v1920_v33 }
  0x8c   :  { %1628 = vmatmul.mubr.msk.f32.gmra.mrb[2].mxu0 %vm113_vm10, %v1415_v1 }
  0x8d   :  { %v75_v3 = vpop.permute.xlu1 %74  ;;  %v72_v4 = vpop.permute.xlu0 %71  ;;  %1630 = vmatprep.mubr.msk.f32.mxu0 %vm113_vm10, %v1416_v2 }
  0x8e   :  { %vm82_vm1 = vcmp.eq.s32.totalorder %v2071_v55, %v72_v4  ;;  %vm83_vm2 = vcmp.eq.s32.totalorder %v2071_v55, %v75_v3 }
  0x8f   :  { %v1418_v6 = vsel %vm82_vm1, 1.0, %v1920_v33  ;;  %v1419_v7 = vsel %vm83_vm2, 1.0, %v1920_v33 }
  0x90   :  { %1631 = vmatmul.mubr.msk.f32.gmra.mrb[4].mxu0 %vm113_vm10, %v1417_v5 }
  0x91   :  { %1633 = vmatprep.mubr.msk.f32.mxu0 %vm113_vm10, %v1418_v6 }
  0x94   :  { %1634 = vmatmul.mubr.msk.f32.gmra.mrb[6].mxu0 %vm113_vm10, %v1419_v7 }
  0x95   :  { %1712 = vmatprep.mubr.msk.bf16.mxu0 %vm413_vm3, %v2124_v19 }
  0xba   :  { %v2109_v14 = vpop.xlane.xlu0 %390 }
  0xbe   :  { %v2128_v20 = vpop.xlane.xlu0 %396 }
  0xbf   :  { %v2111_v15 = vpop.xlane.xlu1 %393 }
  0xc0   :  { %v1844_v16 = vpack.c.bf16 %v2111_v15, %v2109_v14 }
  0xc2   :  { %1845 = vmatprep.subr.bf16.mxu1 %v1844_v16  ;;  %v2130_v21 = vpop.xlane.xlu0 %399 }
  0xc3   :  { %v2133_v26 = vpop.xlane.xlu1 %402  ;;  %v1848_v30 = vpack.c.bf16 %v2130_v21, %v2128_v20 }
  0xc6   :  { %v2135_v28 = vpop.xlane.xlu0 %405 }
  0xc7   :  { %v1852_v35 = vpack.c.bf16 %v2135_v28, %v2133_v26  ;;  %v2142_v36 = vpop.xlane.xlu1 %408 }
  0xca   :  { %v2144_v37 = vpop.xlane.xlu0 %411 }
  0xcb   :  { %v1856_v41 = vpack.c.bf16 %v2144_v37, %v2142_v36 }
 0x15b   :  { %v1626_v22 = vpop.f32.mrb[0].mxu0 }
 0x15c   :  { %v208_v23 = vpop.f32.mrb[1].mxu0 }
 0x15d   :  { %v247_v24 = vpack.c.bf16 %v1626_v22, %v208_v23 }
 0x15f   :  { %v1629_v25 = vpop.f32.mrb[2].mxu0  ;;  %1640 = vmatprep.mubr.msk.bf16.mxu1 %vm264_vm4, %v247_v24 }
 0x160   :  { %v218_v27 = vpop.f32.mrb[3].mxu0 }
 0x161   :  { %v248_v29 = vpack.c.bf16 %v1629_v25, %v218_v27 }
 0x163   :  { %v1632_v31 = vpop.f32.mrb[4].mxu0  ;;  %1641 = vmatmul.mubr.msk.bf16.vlgmr.msra.gmra.mrb[0].mxu1 %vm264_vm4, %v248_v29 }
 0x164   :  { %v228_v32 = vpop.f32.mrb[5].mxu0  ;;  %1847 = vmatpush3.bf16.msra.mxu1 %v1844_v16  ;;  %v2213_v16 = vpack.c.bf16 %v2177_v45, %v2168_v44 }
 0x165   :  { %v249_v34 = vpack.c.bf16 %v1632_v31, %v228_v32  ;;  %1849 = vmatprep.subr.bf16.mxu1 %v1848_v30  ;;  %v2244_v31 = vpack.c.bf16 %v2191_v47, %v2182_v46 }
 0x167   :  { %v1635_v38 = vpop.f32.mrb[6].mxu0  ;;  %1644 = vmatprep.mubr.msk.bf16.mxu1 %vm264_vm4, %v249_v34 }
 0x168   :  { %v238_v39 = vpop.f32.mrb[7].mxu0  ;;  %1851 = vmatpush3.bf16.msra.mxu1 %v1848_v30 }
 0x169   :  { %v250_v40 = vpack.c.bf16 %v1635_v38, %v238_v39  ;;  %1853 = vmatprep.subr.bf16.mxu1 %v1852_v35 }
 0x16b   :  { %1645 = vmatmul.mubr.msk.bf16.gmra.mrb[4].mxu1 %vm264_vm4, %v250_v40  ;;  %v765_v40 = vld [vmem:[%s2407_s5] sm:$0xff] }
 0x16c   :  { %1855 = vmatpush3.bf16.msra.mxu1 %v1852_v35  ;;  %1664 = vmatprep.mubr.msk.f32.mxu1 %vm413_vm3, %v342_v17 }
 0x16d   :  { %1857 = vmatprep.subr.bf16.mxu1 %v1856_v41 }
 0x170   :  { %1859 = vmatpush3.bf16.msra.mxu1 %v1856_v41 }
 0x173   :  { %1665 = vmatmul.mubr.msk.f32.vlgmr.msra.gmra.mrb[8].mxu1 %vm413_vm3, %v2121_v18 }
 0x174   :  { %1667 = vmatprep.mubr.msk.f32.mxu1 %vm413_vm3, %v2154_v42 }
 0x177   :  { %1668 = vmatmul.mubr.msk.f32.gmra.mrb[10].mxu1 %vm413_vm3, %v2163_v43 }
 0x178   :  { %1670 = vmatprep.mubr.msk.f32.mxu1 %vm413_vm3, %v2168_v44 }
 0x17b   :  { %1671 = vmatmul.mubr.msk.f32.gmra.mrb[12].mxu1 %vm413_vm3, %v2177_v45 }
 0x17c   :  { %1673 = vmatprep.mubr.msk.f32.mxu1 %vm413_vm3, %v2182_v46 }
 0x17f   :  { %1674 = vmatmul.mubr.msk.f32.gmra.mrb[14].mxu1 %vm413_vm3, %v2191_v47 }
 0x180   :  { %1692 = vmatprep.mubr.msk.f32.mxu1 %vm413_vm3, %v342_v17 }
 0x236   :  { %v1642_v48 = vpop.f32.mrb[0].mxu1 }
 0x237   :  { %v311_v50 = vpop.f32.mrb[1].mxu1  ;;  %v320_v52 = vadd.f32 %v1642_v48, %v1429_v49 }
 0x238   :  { %v1643_v51 = vpop.f32.mrb[2].mxu1  ;;  %v312_v56 = vadd.f32 %v1429_v49, %v311_v50  ;;  %v768_v50 = vld [vmem:[%s2407_s5 + $0x18] sm:$0xff] }
 0x239   :  { %v323_v53 = vadd.f32 %v1643_v51, %v1429_v49  ;;  %v314_v54 = vpop.f32.mrb[3].mxu1 }
 0x23a   :  { %v315_v57 = vadd.f32 %v1429_v49, %v314_v54 }
 0x23b   :  { %v685_v58 = vpack.c.bf16 %v323_v53, %v320_v52 }
 0x23c   :  { %v684_v59 = vpack.c.bf16 %v315_v57, %v312_v56 }
 0x23e   :  { %v1646_v60 = vpop.f32.mrb[4].mxu1  ;;  %1704 = vmatprep.subr.bf16.mxu0 %v684_v59 }
 0x23f   :  { %v327_v61 = vpop.f32.mrb[5].mxu1  ;;  %1705 = vmatpush3.bf16.msra.mxu0 %v684_v59  ;;  %v336_v63 = vadd.f32 %v1646_v60, %v1429_v49 }
 0x240   :  { %v1647_v62 = vpop.f32.mrb[6].mxu1  ;;  %1706 = vmatprep.subr.bf16.mxu0 %v685_v58  ;;  %v328_v2 = vadd.f32 %v1429_v49, %v327_v61 }
 0x241   :  { %v339_v0 = vadd.f32 %v1647_v62, %v1429_v49  ;;  %v330_v1 = vpop.f32.mrb[7].mxu1 }
 0x242   :  { %v331_v3 = vadd.f32 %v1429_v49, %v330_v1  ;;  %v767_v49 = vld [vmem:[%s2407_s5 + $0x10] sm:$0xff] }
 0x243   :  { %v687_v4 = vpack.c.bf16 %v339_v0, %v336_v63  ;;  %1707 = vmatpush3.bf16.msra.mxu0 %v685_v58  ;;  %v770_v51 = vpack.c.bf16 %v768_v50, %v767_v49 }
 0x244   :  { %v686_v5 = vpack.c.bf16 %v331_v3, %v328_v2 }
 0x246   :  { %v1666_v6 = vpop.f32.mrb[8].mxu1  ;;  %1708 = vmatprep.subr.bf16.mxu0 %v686_v5 }
 0x247   :  { %v2200_v7 = vadd.f32 %v1666_v6, %v2111_v15  ;;  %v504_v8 = vpop.f32.mrb[9].mxu1  ;;  %1709 = vmatpush3.bf16.msra.mxu0 %v686_v5 }
 0x248   :  { %v2203_v9 = vadd.f32 %v504_v8, %v2109_v14  ;;  %1710 = vmatprep.subr.bf16.mxu0 %v687_v4 }
 0x249   :  { %v552_v10 = vmin.f32 %v2200_v7, 1.0 }
 0x24a   :  { %v551_v12 = vmin.f32 %v2203_v9, 1.0  ;;  %v1669_v13 = vpop.f32.mrb[10].mxu1 }
 0x24b   :  { %v2216_v15 = vadd.f32 %v1669_v13, %v2130_v21  ;;  %v514_v17 = vpop.f32.mrb[11].mxu1  ;;  %1711 = vmatpush3.bf16.msra.mxu0 %v687_v4 }
 0x24c   :  { %v1860_v14 = vpack.c.bf16 %v552_v10, %v551_v12  ;;  %v2223_v22 = vadd.f32 %v514_v17, %v2128_v20 }
 0x24d   :  { %v554_v23 = vmin.f32 %v2216_v15, 1.0 }
 0x24e   :  { %v553_v24 = vmin.f32 %v2223_v22, 1.0  ;;  %v1672_v25 = vpop.f32.mrb[12].mxu1  ;;  %1861 = vmatprep.subr.bf16.mxu1 %v1860_v14  ;;  %1713 = vmatmul.mubr.msk.bf16.vlgmr.msra.gmra.mrb[8].mxu0 %vm413_vm3, %v2208_v11 }
 0x24f   :  { %v2230_v21 = vadd.f32 %v1672_v25, %v2135_v28  ;;  %v524_v27 = vpop.f32.mrb[13].mxu1  ;;  %1863 = vmatpush3.bf16.msra.mxu1 %v1860_v14  ;;  %1716 = vmatprep.mubr.msk.bf16.mxu0 %vm413_vm3, %v2213_v16  ;;  %v1084_v25 = vld [vmem:[%s2409_s8] sm:$0xff] }
 0x250   :  { %v1864_v20 = vpack.c.bf16 %v554_v23, %v553_v24  ;;  %v2239_v29 = vadd.f32 %v524_v27, %v2133_v26  ;;  %v1091_v27 = vld [vmem:[%s2410_s9] sm:$0xff] }
 0x251   :  { %v556_v30 = vmin.f32 %v2230_v21, 1.0 }
 0x252   :  { %v555_v28 = vmin.f32 %v2239_v29, 1.0  ;;  %v1675_v32 = vpop.f32.mrb[14].mxu1  ;;  %1865 = vmatprep.subr.bf16.mxu1 %v1864_v20 }
 0x253   :  { %v2248_v34 = vadd.f32 %v1675_v32, %v2144_v37  ;;  %v534_v35 = vpop.f32.mrb[15].mxu1  ;;  %1867 = vmatpush3.bf16.msra.mxu1 %v1864_v20  ;;  %v766_v37 = vld [vmem:[%s2407_s5 + $0x8] sm:$0xff]  ;;  %s1921_s5 = smov 96  }
 0x254   :  { %v1868_v26 = vpack.c.bf16 %v556_v30, %v555_v28  ;;  %v2255_v38 = vadd.f32 %v534_v35, %v2142_v36  ;;  %v769_v48 = vpack.c.bf16 %v766_v37, %v765_v40  ;;  %944 = vrot.lane.b32.xlu0 %v770_v51, %s1921_s5 }
 0x255   :  { %v558_v39 = vmin.f32 %v2248_v34, 1.0 }
 0x256   :  { %v557_v41 = vmin.f32 %v2255_v38, 1.0  ;;  %1869 = vmatprep.subr.bf16.mxu1 %v1868_v26  ;;  %1717 = vmatmul.mubr.msk.bf16.gmra.mrb[12].mxu0 %vm413_vm3, %v2244_v31 }
 0x257   :  { %1871 = vmatpush3.bf16.msra.mxu1 %v1868_v26  ;;  %1740 = vmatprep.mubr.msk.bf16.mxu0 %vm413_vm3, %v2124_v19 }
 0x258   :  { %v1872_v36 = vpack.c.bf16 %v558_v39, %v557_v41  ;;  %942 = vrot.lane.b32.xlu1 %v769_v48, %s1921_s5 }
 0x25a   :  { %1873 = vmatprep.subr.bf16.mxu1 %v1872_v36 }
 0x25b   :  { %1875 = vmatpush3.bf16.msra.mxu1 %v1872_v36 }
 0x25c   :  { %1720 = vmatprep.subr.bf16.mxu1 %v769_v48 }
 0x25e   :  { %1693 = vmatmul.mubr.msk.f32.vlgmr.msra.gmra.mrb[16].mxu1 %vm413_vm3, %v2121_v18  ;;  %v2296_v18 = vld [vmem:[%s2408_s6] ss:$0 sm:$0xff] }
 0x25f   :  { %1695 = vmatprep.mubr.msk.f32.mxu1 %vm413_vm3, %v2154_v42  ;;  %1721 = vmatpush3.bf16.msra.mxu1 %v769_v48 }
 0x260   :  { %1722 = vmatprep.subr.bf16.mxu1 %v770_v51  ;;  %948 = vrot.lane.b32.xlu0 %v2296_v18, %s1921_s5 }
 0x262   :  { %1696 = vmatmul.mubr.msk.f32.gmra.mrb[18].mxu1 %vm413_vm3, %v2163_v43 }
 0x263   :  { %1698 = vmatprep.mubr.msk.f32.mxu1 %vm413_vm3, %v2168_v44  ;;  %1723 = vmatpush3.bf16.msra.mxu1 %v770_v51 }
 0x266   :  { %1699 = vmatmul.mubr.msk.f32.gmra.mrb[20].mxu1 %vm413_vm3, %v2177_v45 }
 0x267   :  { %1701 = vmatprep.mubr.msk.f32.mxu1 %vm413_vm3, %v2182_v46 }
 0x26a   :  { %1702 = vmatmul.mubr.msk.f32.gmra.mrb[22].mxu1 %vm413_vm3, %v2191_v47 }
 0x2c6   :  { %v945_v53 = vpop.permute.xlu0 %944 }
 0x2ca   :  { %v943_v52 = vpop.permute.xlu1 %942 }
 0x2cb   :  { %1748 = vmatprep.subr.bf16.mxu1 %v943_v52 }
 0x321   :  { %v1714_v19 = vpop.f32.mrb[8].mxu0 }
 0x322   :  { %v734_v42 = vpop.f32.mrb[9].mxu0 }
 0x323   :  { %v1715_v43 = vpop.f32.mrb[10].mxu0 }
 0x324   :  { %v773_v44 = vpack.c.bf16 %v1715_v43, %v1714_v19  ;;  %v737_v45 = vpop.f32.mrb[11].mxu0 }
 0x325   :  { %v772_v46 = vpack.c.bf16 %v737_v45, %v734_v42 }
 0x327   :  { %1724 = vmatprep.mubr.msk.bf16.mxu1 %vm264_vm4, %v772_v46 }
 0x328   :  { %1725 = vmatmul.mubr.msk.bf16.vlgmr.msra.gmra.mrb[24].mxu1 %vm264_vm4, %v773_v44 }
 0x329   :  { %v1718_v47 = vpop.f32.mrb[12].mxu0  ;;  %1749 = vmatpush3.bf16.msra.mxu1 %v943_v52 }
 0x32a   :  { %v750_v54 = vpop.f32.mrb[13].mxu0  ;;  %1750 = vmatprep.subr.bf16.mxu1 %v945_v53 }
 0x32b   :  { %v1719_v56 = vpop.f32.mrb[14].mxu0 }
 0x32c   :  { %v775_v57 = vpack.c.bf16 %v1719_v56, %v1718_v47  ;;  %v753_v58 = vpop.f32.mrb[15].mxu0 }
 0x32d   :  { %v774_v59 = vpack.c.bf16 %v753_v58, %v750_v54  ;;  %1751 = vmatpush3.bf16.msra.mxu1 %v945_v53 }
 0x32f   :  { %1728 = vmatprep.mubr.msk.bf16.mxu1 %vm264_vm4, %v774_v59 }
 0x330   :  { %1729 = vmatmul.mubr.msk.bf16.gmra.mrb[28].mxu1 %vm264_vm4, %v775_v57 }
 0x331   :  { %v1694_v60 = vpop.f32.mrb[16].mxu1 }
 0x332   :  { %v665_v61 = vadd.f32 %v1694_v60, %v552_v10  ;;  %v625_v62 = vpop.f32.mrb[17].mxu1 }
 0x333   :  { %v664_v0 = vadd.f32 %v625_v62, %v551_v12 }
 0x334   :  { %v673_v63 = vmin.f32 %v665_v61, 1.0 }
 0x335   :  { %v1697_v1 = vpop.f32.mrb[18].mxu1  ;;  %v672_v4 = vmin.f32 %v664_v0, 1.0 }
 0x336   :  { %v667_v2 = vadd.f32 %v1697_v1, %v554_v23  ;;  %1043 = vperm.xlu1 %1918, %v673_v63   ;;  %v635_v3 = vpop.f32.mrb[19].mxu1 }
 0x337   :  { %v666_v6 = vadd.f32 %v635_v3, %v553_v24 }
 0x338   :  { %v675_v5 = vmin.f32 %v667_v2, 1.0  ;;  %v949_v2 = vpop.permute.xlu0 %948 }
 0x339   :  { %v1700_v8 = vpop.f32.mrb[20].mxu1  ;;  %v674_v9 = vmin.f32 %v666_v6, 1.0 }
 0x33a   :  { %v669_v7 = vadd.f32 %v1700_v8, %v556_v30  ;;  %1038 = vperm.xlu1 %1918, %v672_v4   ;;  %1053 = vperm.xlu0 %1917, %v675_v5   ;;  %v645_v10 = vpop.f32.mrb[21].mxu1 }
 0x33b   :  { %v668_v13 = vadd.f32 %v645_v10, %v555_v28 }
 0x33c   :  { %v677_v12 = vmin.f32 %v669_v7, 1.0 }
 0x33d   :  { %v1703_v15 = vpop.f32.mrb[22].mxu1  ;;  %v676_v22 = vmin.f32 %v668_v13, 1.0 }
 0x33e   :  { %v671_v17 = vadd.f32 %v1703_v15, %v558_v39  ;;  %1048 = vperm.xlu1 %1918, %v674_v9   ;;  %1063 = vperm.xlu0 %1917, %v677_v12   ;;  %v655_v14 = vpop.f32.mrb[23].mxu1 }
 0x33f   :  { %v670_v24 = vadd.f32 %v655_v14, %v557_v41 }
 0x340   :  { %v679_v23 = vmin.f32 %v671_v17, 1.0 }
 0x341   :  { %v678_v21 = vmin.f32 %v670_v24, 1.0 }
 0x342   :  { %1058 = vperm.xlu1 %1918, %v676_v22   ;;  %1073 = vperm.xlu0 %1917, %v679_v23  }
 0x346   :  { %1086 = vperm.xlu0 %1917, %v1084_v25   ;;  %1068 = vperm.xlu1 %1918, %v678_v21  }
 0x34a   :  { %1093 = vperm.xlu1 %1918, %v1091_v27  }
 0x3b9   :  { %v1054_v5 = vpop.permute.xlu0 %1053 }
 0x3bd   :  { %v1064_v24 = vpop.permute.xlu0 %1063 }
 0x3fb   :  { %v1726_v20 = vpop.f32.mrb[24].mxu1 }
 0x3fc   :  { %v837_v29 = vadd.f32 %v1726_v20, %v2296_v18  ;;  %v828_v30 = vpop.f32.mrb[25].mxu1 }
 0x3fd   :  { %v829_v28 = vadd.f32 %v2296_v18, %v828_v30  ;;  %v1727_v32 = vpop.f32.mrb[26].mxu1 }
 0x3fe   :  { %v840_v34 = vadd.f32 %v1727_v32, %v2296_v18  ;;  %v831_v35 = vpop.f32.mrb[27].mxu1  ;;  %v861_v38 = vmax.f32 %v837_v29, 0.0 }
 0x3ff   :  { %v832_v26 = vadd.f32 %v2296_v18, %v831_v35  ;;  %v859_v40 = vmax.f32 %v829_v28, 0.0 }
 0x400   :  { %v862_v39 = vmax.f32 %v840_v34, 0.0 }
 0x401   :  { %v860_v37 = vmax.f32 %v832_v26, 0.0 }
 0x402   :  { %v868_v41 = vpack.c.bf16 %v862_v39, %v861_v38 }
 0x403   :  { %v867_v36 = vpack.c.bf16 %v860_v37, %v859_v40  ;;  %v1730_v48 = vpop.f32.mrb[28].mxu1 }
 0x404   :  { %v853_v49 = vadd.f32 %v1730_v48, %v2296_v18  ;;  %v844_v50 = vpop.f32.mrb[29].mxu1 }
 0x405   :  { %v845_v51 = vadd.f32 %v2296_v18, %v844_v50  ;;  %v1731_v19 = vpop.f32.mrb[30].mxu1  ;;  %1732 = vmatprep.subr.bf16.mxu0 %v867_v36 }
 0x406   :  { %v856_v42 = vadd.f32 %v1731_v19, %v2296_v18  ;;  %v847_v43 = vpop.f32.mrb[31].mxu1  ;;  %1733 = vmatpush3.bf16.msra.mxu0 %v867_v36  ;;  %v865_v45 = vmax.f32 %v853_v49, 0.0  ;;  %v1074_v49 = vpop.permute.xlu0 %1073 }
 0x407   :  { %v848_v44 = vadd.f32 %v2296_v18, %v847_v43  ;;  %1734 = vmatprep.subr.bf16.mxu0 %v868_v41  ;;  %v863_v46 = vmax.f32 %v845_v51, 0.0 }
 0x408   :  { %v866_v52 = vmax.f32 %v856_v42, 0.0 }
 0x409   :  { %v864_v47 = vmax.f32 %v848_v44, 0.0 }
 0x40a   :  { %v870_v53 = vpack.c.bf16 %v866_v52, %v865_v45  ;;  %1735 = vmatpush3.bf16.msra.mxu0 %v868_v41 }
 0x40b   :  { %v869_v54 = vpack.c.bf16 %v864_v47, %v863_v46  ;;  %v1087_v46 = vpop.permute.xlu0 %1086 }
 0x40c   :  { %vm1088_vm6 = vcmp.eq.s32.totalorder %v2071_v55, %v1087_v46 }
 0x40d   :  { %1736 = vmatprep.subr.bf16.mxu0 %v869_v54 }
 0x40e   :  { %1737 = vmatpush3.bf16.msra.mxu0 %v869_v54  ;;  %v1249_v54 = vld [vmem:[%s2411_s10 + $0x28] sm:$0xff] }
 0x40f   :  { %1738 = vmatprep.subr.bf16.mxu0 %v870_v53 }
 0x412   :  { %1739 = vmatpush3.bf16.msra.mxu0 %v870_v53  ;;  %v1248_v53 = vld [vmem:[%s2411_s10 + $0x20] sm:$0xff] }
 0x415   :  { %1741 = vmatmul.mubr.msk.bf16.vlgmr.msra.gmra.mrb[16].mxu0 %vm413_vm3, %v2208_v11 }
 0x416   :  { %1744 = vmatprep.mubr.msk.bf16.mxu0 %vm413_vm3, %v2213_v16  ;;  %v1922_v16 = vmov 0.0|0.0  }
 0x417   :  { %1876 = vmatprep.subr.bf16.mxu0 %v1922_v16  ;;  %1888 = vmatprep.subr.bf16.mxu1 %v1922_v16 }
 0x41d   :  { %1745 = vmatmul.mubr.msk.bf16.gmra.mrb[20].mxu0 %vm413_vm3, %v2244_v31  ;;  %v1044_v31 = vpop.permute.xlu1 %1043 }
 0x41e   :  { %1776 = vmatprep.mubr.msk.f32.mxu0 %vm1923_vm5, %v1920_v33 }
 0x421   :  { %v1039_v3 = vpop.permute.xlu1 %1038 }
 0x425   :  { %v1049_v7 = vpop.permute.xlu1 %1048 }
 0x429   :  { %v1059_v27 = vpop.permute.xlu1 %1058 }
 0x42d   :  { %v1069_v50 = vpop.permute.xlu1 %1068 }
 0x431   :  { %v1094_v47 = vpop.permute.xlu1 %1093 }
 0x432   :  { %vm1095_vm7 = vcmp.eq.s32.totalorder %v2071_v55, %v1094_v47 }
 0x4e8   :  { %v1742_v18 = vpop.f32.mrb[16].mxu0 }
 0x4e9   :  { %v905_v56 = vpop.f32.mrb[17].mxu0 }
 0x4ea   :  { %v1743_v57 = vpop.f32.mrb[18].mxu0 }
 0x4eb   :  { %v937_v58 = vpack.c.bf16 %v1743_v57, %v1742_v18  ;;  %v908_v59 = vpop.f32.mrb[19].mxu0  ;;  %v1901_v18 = vpack.c.bf16 %v1249_v54, %v1248_v53  ;;  %v1251_v57 = vld [vmem:[%s2411_s10 + $0x38] sm:$0xff] }
 0x4ec   :  { %v936_v60 = vpack.c.bf16 %v908_v59, %v905_v56  ;;  %v1250_v56 = vld [vmem:[%s2411_s10 + $0x30] sm:$0xff]  ;;  %v1477_v59 = vsel %vm1095_vm7, 1.0, %v1920_v33 }
 0x4ed   :  { %v1904_v55 = vpack.c.bf16 %v1251_v57, %v1250_v56 }
 0x4ee   :  { %1752 = vmatprep.mubr.msk.bf16.mxu1 %vm264_vm4, %v936_v60  ;;  %v1244_v60 = vld [vmem:[%s2411_s10] sm:$0xff] }
 0x4ef   :  { %1753 = vmatmul.mubr.msk.bf16.vlgmr.msra.gmra.mrb[32].mxu1 %vm264_vm4, %v937_v58  ;;  %v1476_v58 = vsel %vm1088_vm6, 1.0, %v1920_v33 }
 0x4f0   :  { %v1746_v61 = vpop.f32.mrb[20].mxu0 }
 0x4f1   :  { %v921_v62 = vpop.f32.mrb[21].mxu0 }
 0x4f2   :  { %v1747_v63 = vpop.f32.mrb[22].mxu0 }
 0x4f3   :  { %v939_v11 = vpack.c.bf16 %v1747_v63, %v1746_v61  ;;  %v924_v0 = vpop.f32.mrb[23].mxu0  ;;  %v1245_v61 = vld [vmem:[%s2411_s10 + $0x8] sm:$0xff]  ;;  %v1246_v63 = vld [vmem:[%s2411_s10 + $0x10] sm:$0xff] }
 0x4f4   :  { %v938_v1 = vpack.c.bf16 %v924_v0, %v921_v62  ;;  %v1907_v62 = vpack.c.bf16 %v1245_v61, %v1244_v60 }
 0x4f6   :  { %1756 = vmatprep.mubr.msk.bf16.mxu1 %vm264_vm4, %v938_v1 }
 0x4f7   :  { %1757 = vmatmul.mubr.msk.bf16.gmra.mrb[36].mxu1 %vm264_vm4, %v939_v11  ;;  %v1247_v11 = vld [vmem:[%s2411_s10 + $0x18] sm:$0xff] }
 0x4f8   :  { %1795 = vmatprep.mubr.msk.f32.mxu1 %vm1923_vm5, %v1920_v33 }
 0x5c2   :  { %v1754_v4 = vpop.f32.mrb[32].mxu1 }
 0x5c3   :  { %v1006_v6 = vadd.f32 %v1754_v4, %v949_v2  ;;  %v997_v8 = vpop.f32.mrb[33].mxu1 }
 0x5c4   :  { %v998_v10 = vadd.f32 %v997_v8, %v949_v2  ;;  %v1755_v9 = vpop.f32.mrb[34].mxu1  ;;  %v1482_v8 = vld [vmem:[%s2412_s11] ss:$0 sm:$0xff] }
 0x5c5   :  { %v1030_v12 = vmax.f32 %v1006_v6, 0.0  ;;  %v1009_v13 = vadd.f32 %v1755_v9, %v949_v2  ;;  %v1000_v15 = vpop.f32.mrb[35].mxu1 }
 0x5c6   :  { %v1028_v17 = vmax.f32 %v998_v10, 0.0  ;;  %v1001_v14 = vadd.f32 %v1000_v15, %v949_v2 }
 0x5c7   :  { %v1031_v22 = vmax.f32 %v1009_v13, 0.0  ;;  %v1078_v25 = vmul.f32 %v1049_v7, %v1030_v12 }
 0x5c8   :  { %v1029_v23 = vmax.f32 %v1001_v14, 0.0  ;;  %v1076_v20 = vmul.f32 %v1039_v3, %v1028_v17  ;;  %v1910_v3 = vpack.c.bf16 %v1247_v11, %v1246_v63 }
 0x5c9   :  { %v1079_v21 = vmul.f32 %v1054_v5, %v1031_v22 }
 0x5ca   :  { %v1077_v29 = vmul.f32 %v1044_v31, %v1029_v23  ;;  %v1758_v30 = vpop.f32.mrb[36].mxu1 }
 0x5cb   :  { %v1880_v28 = vpack.c.bf16 %v1079_v21, %v1078_v25  ;;  %v1022_v32 = vadd.f32 %v1758_v30, %v949_v2  ;;  %v1013_v34 = vpop.f32.mrb[37].mxu1 }
 0x5cc   :  { %v1877_v35 = vpack.c.bf16 %v1077_v29, %v1076_v20  ;;  %v1014_v26 = vadd.f32 %v1013_v34, %v949_v2  ;;  %v1759_v38 = vpop.f32.mrb[38].mxu1 }
 0x5cd   :  { %v1034_v39 = vmax.f32 %v1022_v32, 0.0  ;;  %v1025_v40 = vadd.f32 %v1759_v38, %v949_v2  ;;  %v1016_v37 = vpop.f32.mrb[39].mxu1 }
 0x5ce   :  { %v1032_v41 = vmax.f32 %v1014_v26, 0.0  ;;  %v1017_v36 = vadd.f32 %v1016_v37, %v949_v2  ;;  %1878 = vmatpush3.bf16.msra.mxu0 %v1877_v35  ;;  %1890 = vmatpush3.bf16.msra.mxu1 %v1877_v35 }
 0x5cf   :  { %v1035_v48 = vmax.f32 %v1025_v40, 0.0  ;;  %1879 = vmatprep.subr.bf16.mxu0 %v1922_v16  ;;  %1891 = vmatprep.subr.bf16.mxu1 %v1922_v16  ;;  %v1082_v19 = vmul.f32 %v1069_v50, %v1034_v39 }
 0x5d0   :  { %v1033_v51 = vmax.f32 %v1017_v36, 0.0  ;;  %v1080_v43 = vmul.f32 %v1059_v27, %v1032_v41 }
 0x5d1   :  { %v1083_v42 = vmul.f32 %v1074_v49, %v1035_v48 }
 0x5d2   :  { %v1081_v44 = vmul.f32 %v1064_v24, %v1033_v51  ;;  %1881 = vmatpush3.bf16.msra.mxu0 %v1880_v28  ;;  %1893 = vmatpush3.bf16.msra.mxu1 %v1880_v28 }
 0x5d3   :  { %v1886_v45 = vpack.c.bf16 %v1083_v42, %v1082_v19  ;;  %1882 = vmatprep.subr.bf16.mxu0 %v1922_v16  ;;  %1894 = vmatprep.subr.bf16.mxu1 %v1922_v16 }
 0x5d4   :  { %v1883_v52 = vpack.c.bf16 %v1081_v44, %v1080_v43 }
 0x5d6   :  { %1884 = vmatpush3.bf16.msra.mxu0 %v1883_v52  ;;  %1896 = vmatpush3.bf16.msra.mxu1 %v1883_v52 }
 0x5d7   :  { %1885 = vmatprep.subr.bf16.mxu0 %v1922_v16  ;;  %1897 = vmatprep.subr.bf16.mxu1 %v1922_v16 }
 0x5da   :  { %1887 = vmatpush3.bf16.msra.mxu0 %v1886_v45  ;;  %1899 = vmatpush3.bf16.msra.mxu1 %v1886_v45 }
 0x5db   :  { %1900 = vmatprep.subr.bf16.mxu0 %v1922_v16 }
 0x5dd   :  { %1777 = vmatmul.mubr.msk.f32.vlgmr.msra.gmra.mrb[24].mxu0 %vm413_vm3, %v1476_v58  ;;  %1796 = vmatmul.mubr.msk.f32.vlgmr.msra.gmra.mrb[40].mxu1 %vm413_vm3, %v1477_v59 }
 0x5de   :  { %1902 = vmatpush3.bf16.msra.mxu0 %v1901_v18  ;;  %1806 = vmatprep.mubr.msk.f32.mxu0 %vm1923_vm5, %v1920_v33 }
 0x5df   :  { %1903 = vmatprep.subr.bf16.mxu0 %v1922_v16 }
 0x5e2   :  { %1905 = vmatpush3.bf16.msra.mxu0 %v1904_v55 }
 0x5e3   :  { %1906 = vmatprep.subr.bf16.mxu0 %v1922_v16 }
 0x6b0   :  { %v1167_v0 = vpop.f32.mrb[24].mxu0  ;;  %v1240_v1 = vpop.f32.mrb[40].mxu1 }
 0x6b1   :  { %v1778_v31 = vpop.f32.mrb[25].mxu0  ;;  %v1797_v2 = vpop.f32.mrb[41].mxu1  ;;  %1807 = vmatmul.mubr.msk.f32.vlgmr.msra.gmra.mrb[26].mxu0 %vm264_vm4, %v1240_v1 }
 0x6b2   :  { %1908 = vmatpush3.bf16.msra.mxu0 %v1907_v62  ;;  %1817 = vmatprep.mubr.msk.f32.mxu0 %vm1923_vm5, %v1920_v33 }
 0x6b3   :  { %1909 = vmatprep.subr.bf16.mxu0 %v1922_v16 }
 0x6b6   :  { %1911 = vmatpush3.bf16.msra.mxu0 %v1910_v3 }
 0x6b9   :  { %1818 = vmatmul.mubr.msk.f32.vlgmr.msra.gmra.mrb[28].mxu0 %vm264_vm4, %v1167_v0 }
 0x784   :  { %v1321_v4 = vpop.f32.mrb[26].mxu0 }
 0x785   :  { %v1808_v5 = vpop.f32.mrb[27].mxu0 }
 0x78c   :  { %v1394_v6 = vpop.f32.mrb[28].mxu0 }
 0x78d   :  { %v1395_v7 = vadd.f32 %v1394_v6, %v1321_v4  ;;  %v1819_v10 = vpop.f32.mrb[29].mxu0 }
 0x78f   :  { %v1405_v9 = vadd.f32 %v1482_v8, %v1395_v7 }
 0x791   :  { %1407 = vst.msk [vmem:[%s2413_s12] sm:$0xff] %vm1406_vm8, %v1405_v9 }

</bundles_post_ra>
